<compile_context>
chip_gen: v7x
topology: tpu7x:2x2x1
jax: 0.10.0
libtpu: 0.0.40
codegen_flags: <defaults>
</compile_context>

<pallas_src>
import numpy as np
import jax
import jax.numpy as jnp
from jax.experimental import pallas as pl
from jax.experimental.pallas import tpu as pltpu


def _pe_kernel(times_ref, scale_ref, phase_ref, out_ref):
    # times_ref: (tn, 1)        flattened (t*B + b) timestamps
    # scale_ref: (1, d_model)   [1/ts, 1/ts]          (same block every grid step)
    # phase_ref: (1, d_model)   [0 ... 0, pi/2 ...]   (same block every grid step)
    # out_ref:   (tn, d_model)  lane-dense output tile
    t = times_ref[...]                                   # (tn, 1)
    arg = t * scale_ref[...] + phase_ref[...]            # broadcast -> (tn, d_model)
    out_ref[...] = jnp.sin(arg)                          # single EUP op per element


def _pick_row_tile(n_rows, d_model, target_bytes=2 * 1024 * 1024):
    """Pick a sublane-aligned row tile giving ~target_bytes output tiles.

    `n_rows` must be a multiple of 8 (or small enough to be a single tile).
    """
    target = max(8, (target_bytes // (d_model * 4)) // 8 * 8)
    if n_rows <= target:
        return n_rows                      # single tile; full-dim block is legal
    tn = min(target, n_rows)
    tn -= tn % 8
    while n_rows % tn != 0:
        tn -= 8
    return tn


def positional_encoding_tf(P_time, d_model, max_len=500, MAX=10000, *, row_tile=None):
    """Pallas equivalent of PositionalEncodingTF.forward.

    P_time: [T, B] array of timestamps.
    Returns: [T, B, d_model] float32 positional encodings
             (channels [0:H) = sin, [H:d_model) = cos).
    """
    assert P_time.ndim == 2, "P_time must be [T, B]"
    assert d_model % 2 == 0, "d_model must be even (sin/cos halves)"
    T, B = P_time.shape
    H = d_model // 2
    N = T * B

    # Deterministic "parameters": timescales built in f64 (numpy default, as in
    # the PyTorch module), reciprocals taken against the f32-cast values so the
    # in-kernel multiply matches torch's f32 division as closely as possible.
    ts64 = np.asarray(max_len, dtype=np.float64) ** np.linspace(0.0, 1.0, H)
    inv_ts = (1.0 / ts64.astype(np.float32)).astype(np.float32)
    scale = jnp.asarray(np.concatenate([inv_ts, inv_ts])[None, :])                 # (1, d_model)
    phase = jnp.asarray(np.concatenate([np.zeros(H, np.float32),
                                        np.full(H, np.pi / 2, np.float32)])[None, :])

    times = P_time.astype(jnp.float32).reshape(N, 1)

    # Pad rows to a sublane multiple so the grid can tile cleanly.
    pad = 0
    N_pad = N
    if N > 8 and N % 8 != 0:
        N_pad = ((N + 7) // 8) * 8
        pad = N_pad - N
        times = jnp.pad(times, ((0, pad), (0, 0)))

    tn = row_tile if row_tile is not None else _pick_row_tile(N_pad, d_model)
    assert N_pad % tn == 0, "row_tile must divide the (padded) T*B"

    out = pl.pallas_call(
        _pe_kernel,
        out_shape=jax.ShapeDtypeStruct((N_pad, d_model), jnp.float32),
        grid=(N_pad // tn,),
        in_specs=[
            pl.BlockSpec((tn, 1), lambda i: (i, 0)),
            pl.BlockSpec((1, d_model), lambda i: (0, 0)),
            pl.BlockSpec((1, d_model), lambda i: (0, 0)),
        ],
        out_specs=pl.BlockSpec((tn, d_model), lambda i: (i, 0)),
        compiler_params=pltpu.CompilerParams(
            dimension_semantics=("parallel",),
            vmem_limit_bytes=32 * 1024 * 1024,
        ),
    )(times, scale, phase)

    if pad:
        out = out[:N]
    return out.reshape(T, B, d_model)


if __name__ == "__main__":
    # Small shapes consistent with the module's forward: seq=8, batch=2, d_model=32.
    T, B, d_model, max_len = 8, 2, 32, 500
    key = jax.random.PRNGKey(0)
    # Timestamps in [0, max_len)
    P_time = jax.random.uniform(key, (T, B), dtype=jnp.float32) * max_len

    pe = positional_encoding_tf(P_time, d_model, max_len=max_len)
    pe = jax.block_until_ready(pe)

    # Reference mirroring the PyTorch module exactly (float32 math, like torch.Tensor):
    H = d_model // 2
    ts32 = (max_len ** np.linspace(0.0, 1.0, H)).astype(np.float32)
    times32 = np.asarray(P_time, dtype=np.float32)[:, :, None]
    scaled = times32 / ts32[None, None, :]
    ref = np.concatenate([np.sin(scaled), np.cos(scaled)], axis=-1).astype(np.float32)

    assert pe.shape == (T, B, d_model)
    assert pe.dtype == jnp.float32
    # Tolerance: f32 transcendentals at arguments up to max_len plus the
    # multiply-by-reciprocal and cos(x)=sin(x+pi/2) reformulation contribute up
    # to ~|arg| * few-ULP ~ 1e-4 absolute; values are O(1), so atol dominates.
    np.testing.assert_allclose(np.asarray(pe), ref, rtol=5e-3, atol=5e-4)

    print("KERNEL_OK")
</pallas_src>

<mosaic_0001>
module attributes {stable_mosaic.version = 11 : i64} {
  func.func @_pe_kernel(%arg0: i32, %arg1: memref<16x1xf32, #tpu.memory_space<vmem>>, %arg2: memref<1x32xf32, #tpu.memory_space<vmem>>, %arg3: memref<1x32xf32, #tpu.memory_space<vmem>>, %arg4: memref<16x32xf32, #tpu.memory_space<vmem>>) attributes {dimension_semantics = [#tpu.dimension_semantics<parallel>], iteration_bounds = array<i64: 1>, scalar_prefetch = 0 : i64, scratch_operands = 0 : i64, tpu.core_type = #tpu.core_type<tc>, window_params = [{transform_indices = @transform_0, window_bounds = array<i64: 16, 1>}, {pipeline_mode = #tpu.pipeline_mode<synchronous>, transform_indices = @transform_1, window_bounds = array<i64: 1, 32>}, {pipeline_mode = #tpu.pipeline_mode<synchronous>, transform_indices = @transform_2, window_bounds = array<i64: 1, 32>}, {transform_indices = @transform_3, window_bounds = array<i64: 16, 32>}]} {
    %c0 = arith.constant 0 : index
    %c0_0 = arith.constant 0 : index
    %0 = vector.load %arg1[%c0, %c0_0] : memref<16x1xf32, #tpu.memory_space<vmem>>, vector<16x1xf32>
    %c0_1 = arith.constant 0 : index
    %c0_2 = arith.constant 0 : index
    %1 = vector.load %arg2[%c0_1, %c0_2] : memref<1x32xf32, #tpu.memory_space<vmem>>, vector<1x32xf32>
    %2 = vector.broadcast %0 : vector<16x1xf32> to vector<16x32xf32>
    %3 = vector.broadcast %1 : vector<1x32xf32> to vector<16x32xf32>
    %4 = arith.mulf %2, %3 : vector<16x32xf32>
    %c0_3 = arith.constant 0 : index
    %c0_4 = arith.constant 0 : index
    %5 = vector.load %arg3[%c0_3, %c0_4] : memref<1x32xf32, #tpu.memory_space<vmem>>, vector<1x32xf32>
    %6 = vector.broadcast %5 : vector<1x32xf32> to vector<16x32xf32>
    %7 = arith.addf %4, %6 : vector<16x32xf32>
    %8 = math.sin %7 : vector<16x32xf32>
    %c0_5 = arith.constant 0 : index
    %c0_6 = arith.constant 0 : index
    %9 = vector.load %arg4[%c0_5, %c0_6] : memref<16x32xf32, #tpu.memory_space<vmem>>, vector<16x32xf32>
    tpu.vector_store %arg4[%c0_5, %c0_6], %8 {strides = array<i32>} : memref<16x32xf32, #tpu.memory_space<vmem>>, vector<16x32xf32>,
    return
  }
  func.func @transform_0(%arg0: i32) -> (i32, i32) {
    %c0_i32 = arith.constant 0 : i32
    %c0_i32_0 = arith.constant 0 : i32
    return %arg0, %c0_i32 : i32, i32
  }
  func.func @transform_1(%arg0: i32) -> (i32, i32) {
    %c0_i32 = arith.constant 0 : i32
    %c0_i32_0 = arith.constant 0 : i32
    %c0_i32_1 = arith.constant 0 : i32
    return %c0_i32, %c0_i32_0 : i32, i32
  }
  func.func @transform_2(%arg0: i32) -> (i32, i32) {
    %c0_i32 = arith.constant 0 : i32
    %c0_i32_0 = arith.constant 0 : i32
    %c0_i32_1 = arith.constant 0 : i32
    return %c0_i32, %c0_i32_0 : i32, i32
  }
  func.func @transform_3(%arg0: i32) -> (i32, i32) {
    %c0_i32 = arith.constant 0 : i32
    %c0_i32_0 = arith.constant 0 : i32
    return %arg0, %c0_i32 : i32, i32
  }
}

</mosaic_0001>

<bundles_post_ra>
// kernel: tpu_custom_call.1
= control target key start
LH: loop header
LB: loop body
LE: loop exit
PB: predicated region body
PF: predicated region fallthrough
CT: control target
= control target key end

     0   :  { %v333_v1 = vmov 0   ;;  %s457_s0 = inlined_call_operand.vmem [shape: f32[16,1], index: 0, kind: input, shape index: {}]   ;;  %s458_s1 = inlined_call_operand.vmem [shape: f32[1,32], index: 1, kind: input, shape index: {}]   ;;  %s459_s2 = inlined_call_operand.vmem [shape: f32[1,32], index: 2, kind: input, shape index: {}]   ;;  %s460_s3 = inlined_call_operand.hbm [shape: f32[16,32], index: 3, kind: output, shape index: {}]  }
   0x1   :  { %v15_v0 = vld [vmem:[%s457_s0] sm:$0xff]  ;;  %300 = vset.pattern.permute.xlu0 %v333_v1  ;;  %v16_v2 = vld [vmem:[%s457_s0 + $0x8] sm:$0xff] }
   0x2   :  { %20 = vperm.xlu0 %300, %v15_v0  }
   0x3   :  { %8 = vsyncpa [#allocation3], 0  ;;  %v272_v3 = vld [vmem:[%s458_s1] ss:$0 sm:$0xff]  ;;  %v334_v27 = vmov 683565275  }
   0x4   :  { %v273_v4 = vld [vmem:[%s459_s2] ss:$0 sm:$0xff]  ;;  %v335_v31 = vmov 2475754826   ;;  %v336_v33 = vmov 2131351028  }
   0x5   :  { %v337_v35 = vmov 2102212464   ;;  %v338_v37 = vmov 920167782   ;;  %v339_v44 = vmov 1326507024  }
   0x6   :  { %25 = vperm.xlu0 %300, %v16_v2   ;;  %s340_s0 = smov [#allocation2]  }
   0x7   :  { %s261_s1 = sshll.u32 %s340_s0, 4  ;;  %s262_s1 = int_to_ptr.vmem [resolvable:$true] %s261_s1 }
   0x8   :  { %s309_s2 = scalar_lea.vmem %s262_s1, 256  ;;  %p314_p1 = scmp.lt.s32.totalorder %s262_s1, %s262_s1 }
   0x9   :  { %p310_p0 = scmp.ne.s32.totalorder %s262_s1, %s309_s2  ;;  %p315_p2 = scmp.lt.s32.totalorder %s309_s2, %s309_s2 }
   0xb   :  { %p316_p3 = por %p315_p2, %p314_p1 }
   0xd   :  { %p317_p4 = pnand %p316_p3, %p310_p0 }
  0x81   :  { %v21_v5 = vpop.permute.xlu0 %20 }
  0x82   :  { %v34_v6 = vmul.f32 %v272_v3, %v21_v5 }
  0x84   :  { %v375_v7 = vadd.f32 %v273_v4, %v34_v6 }
  0x85   :  { %v26_v8 = vpop.permute.xlu0 %25 }
  0x86   :  { %v45_v9 = vand.u32 2147483647, %v375_v7  ;;  %v48_v10 = vand.u32 2139095040, %v375_v7  ;;  %v35_v11 = vmul.f32 %v272_v3, %v26_v8  ;;  %vm47_vm14 = vcmp.lt.s32.totalorder %v375_v7, 0 }
  0x88   :  { %v49_v12 = vshrl.u32 %v48_v10, 23  ;;  %v379_v13 = vadd.f32 %v273_v4, %v35_v11  ;;  %v52_v14 = vand.u32 8388607, %v45_v9  ;;  %vm46_vm15 = vcmp.le.f32.partialorder %v45_v9, 0.7853982 }
  0x8a   :  { %v274_v15 = vadd.s32 4294967169, %v49_v12  ;;  %v152_v16 = vand.u32 2139095040, %v379_v13  ;;  %v53_v18 = vor.u32 8388608, %v52_v14  ;;  %v149_v20 = vand.u32 2147483647, %v379_v13 }
  0x8c   :  { %v55_v17 = vadd.s32 1, %v274_v15  ;;  %v153_v19 = vshrl.u32 %v152_v16, 23  ;;  %v385_v25 = vshll.u32 %v53_v18, 8  ;;  %v156_v29 = vand.u32 8388607, %v149_v20 }
  0x8e   :  { %vm56_vm0 = vcmp.gt.s32.totalorder %v55_v17, 0  ;;  %v278_v22 = vadd.s32 4294967169, %v153_v19  ;;  %v157_v59 = vor.u32 8388608, %v156_v29 }
  0x8f   :  { %v57_v21 = vsel %vm56_vm0, %v55_v17, 0  ;;  %vm151_vm0 = vcmp.lt.s32.totalorder %v379_v13, 0 }
  0x90   :  { %v58_v23 = vshrl.u32 %v57_v21, 5  ;;  %v59_v24 = vand.u32 31, %v57_v21  ;;  %v159_v30 = vadd.s32 1, %v278_v22  ;;  %v197_v10 = vshll.u32 %v157_v59, 8 }
  0x92   :  { %v60_v26 = vsub.s32 32, %v59_v24  ;;  %v62_v28 = vshll.u32 %v334_v27, %v59_v24  ;;  %v65_v32 = vshll.u32 %v335_v31, %v59_v24  ;;  %v68_v34 = vshll.u32 %v336_v33, %v59_v24 }
  0x93   :  { %v71_v36 = vshll.u32 %v337_v35, %v59_v24  ;;  %v74_v38 = vshll.u32 %v338_v37, %v59_v24  ;;  %vm77_vm1 = vcmp.lt.s32.totalorder %v58_v23, 1  ;;  %vm79_vm2 = vcmp.lt.s32.totalorder %v58_v23, 3 }
  0x94   :  { %v63_v39 = vshrl.u32 %v335_v31, %v60_v26  ;;  %v66_v40 = vshrl.u32 %v336_v33, %v60_v26  ;;  %v69_v41 = vshrl.u32 %v337_v35, %v60_v26  ;;  %v61_v42 = vshrl.u32 %v334_v27, %v60_v26 }
  0x95   :  { %v72_v43 = vshrl.u32 %v338_v37, %v60_v26  ;;  %v75_v45 = vshrl.u32 %v339_v44, %v60_v26  ;;  %vm160_vm3 = vcmp.gt.s32.totalorder %v159_v30, 0  ;;  %vm80_vm4 = vcmp.lt.s32.totalorder %v58_v23, 4 }
  0x96   :  { %v64_v46 = vor.u32 %v63_v39, %v62_v28  ;;  %v67_v47 = vor.u32 %v66_v40, %v65_v32  ;;  %v70_v48 = vor.u32 %v69_v41, %v68_v34  ;;  %v161_v51 = vsel %vm160_vm3, %v159_v30, 0 }
  0x97   :  { %v73_v49 = vor.u32 %v72_v43, %v71_v36  ;;  %v76_v50 = vor.u32 %v75_v45, %v74_v38  ;;  %vm78_vm5 = vcmp.lt.s32.totalorder %v58_v23, 2  ;;  %v163_v62 = vand.u32 31, %v161_v51 }
  0x98   :  { %v81_v52 = vsel %vm77_vm1, %v61_v42, %v64_v46  ;;  %v82_v53 = vsel %vm80_vm4, %v70_v48, 2102212464  ;;  %v85_v54 = vsel %vm77_vm1, %v64_v46, %v67_v47  ;;  %v89_v55 = vsel %vm77_vm1, %v67_v47, %v70_v48 }
  0x99   :  { %v83_v56 = vsel %vm79_vm2, %v67_v47, %v82_v53  ;;  %v86_v57 = vsel %vm80_vm4, %v73_v49, 920167782  ;;  %v90_v58 = vsel %vm80_vm4, %v76_v50, 1326507024  ;;  %v162_v6 = vshrl.u32 %v161_v51, 5 }
  0x9a   :  { %v87_v60 = vsel %vm79_vm2, %v70_v48, %v86_v57  ;;  %v91_v61 = vsel %vm79_vm2, %v73_v49, %v90_v58  ;;  %v84_v63 = vsel %vm78_vm5, %v81_v52, %v83_v56  ;;  %v164_v8 = vsub.s32 32, %v163_v62 }
  0x9b   :  { %v88_v0 = vsel %vm78_vm5, %v85_v54, %v87_v60  ;;  %v92_v1 = vsel %vm78_vm5, %v89_v55, %v91_v61  ;;  %v100_v11 = vmul.u32 %v385_v25, %v84_v63  ;;  %v166_v12 = vshll.u32 %v334_v27, %v163_v62 }
  0x9c   :  { %v398_v2 = vmul.u32.u64.low %v385_v25, %v92_v1  ;;  %v399_v3 = vmul.u32.u64.high %v385_v25, %v92_v1, %v398_v2  ;;  %v402_v4 = vmul.u32.u64.low %v385_v25, %v88_v0  ;;  %v403_v5 = vmul.u32.u64.high %v385_v25, %v88_v0, %v402_v4 }
  0x9d   :  { %v169_v14 = vshll.u32 %v335_v31, %v163_v62  ;;  %v172_v15 = vshll.u32 %v336_v33, %v163_v62  ;;  %v167_v16 = vshrl.u32 %v335_v31, %v164_v8  ;;  %v170_v17 = vshrl.u32 %v336_v33, %v164_v8 }
  0x9e   :  { %v173_v18 = vshrl.u32 %v337_v35, %v164_v8  ;;  %v175_v19 = vshll.u32 %v337_v35, %v163_v62  ;;  %vm102_vm6 = vc.u32 %v399_v3, %v402_v4  ;;  %v103_v21 = vadd.s32 1, %v403_v5 }
  0x9f   :  { %v176_v22 = vshrl.u32 %v338_v37, %v164_v8  ;;  %v178_v23 = vshll.u32 %v338_v37, %v163_v62  ;;  %v168_v24 = vor.u32 %v167_v16, %v166_v12  ;;  %v171_v26 = vor.u32 %v170_v17, %v169_v14 }
  0xa0   :  { %v174_v28 = vor.u32 %v173_v18, %v172_v15  ;;  %v179_v29 = vshrl.u32 %v339_v44, %v164_v8  ;;  %v104_v25 = vsel %vm102_vm6, %v103_v21, %v403_v5  ;;  %vm181_vm7 = vcmp.lt.s32.totalorder %v162_v6, 1 }
  0xa1   :  { %v177_v30 = vor.u32 %v176_v22, %v175_v19  ;;  %vm184_vm8 = vcmp.lt.s32.totalorder %v162_v6, 4  ;;  %v105_v31 = vadd.s32 %v104_v25, %v100_v11  ;;  %vm183_vm9 = vcmp.lt.s32.totalorder %v162_v6, 3 }
  0xa2   :  { %v180_v32 = vor.u32 %v179_v29, %v178_v23  ;;  %v186_v33 = vsel %vm184_vm8, %v174_v28, 2102212464  ;;  %v165_v34 = vshrl.u32 %v334_v27, %v164_v8  ;;  %v189_v35 = vsel %vm181_vm7, %v168_v24, %v171_v26 }
  0xa3   :  { %v190_v36 = vsel %vm184_vm8, %v177_v30, 920167782  ;;  %v193_v38 = vsel %vm181_vm7, %v171_v26, %v174_v28  ;;  %v106_v39 = vadd.s32 536870912, %v105_v31  ;;  %vm182_vm10 = vcmp.lt.s32.totalorder %v162_v6, 2 }
  0xa4   :  { %v191_v37 = vsel %vm183_vm9, %v174_v28, %v190_v36  ;;  %v194_v40 = vsel %vm184_vm8, %v180_v32, 1326507024  ;;  %v185_v41 = vsel %vm181_vm7, %v165_v34, %v168_v24  ;;  %v187_v42 = vsel %vm183_vm9, %v171_v26, %v186_v33 }
  0xa5   :  { %v192_v43 = vsel %vm182_vm10, %v189_v35, %v191_v37  ;;  %v195_v44 = vsel %vm183_vm9, %v177_v30, %v194_v40  ;;  %v107_v45 = vshrl.u32 %v106_v39, 30  ;;  %v188_v51 = vsel %vm182_vm10, %v185_v41, %v187_v42 }
  0xa6   :  { %v196_v46 = vsel %vm182_vm10, %v193_v38, %v195_v44  ;;  %v413_v47 = vmul.u32.u64.low %v197_v10, %v192_v43  ;;  %v414_v48 = vmul.u32.u64.high %v197_v10, %v192_v43, %v413_v47  ;;  %v204_v54 = vmul.u32 %v197_v10, %v188_v51 }
  0xa7   :  { %v416_v49 = vmul.u32.u64.low %v197_v10, %v196_v46  ;;  %v417_v50 = vmul.u32.u64.high %v197_v10, %v196_v46, %v416_v49  ;;  %v108_v27 = vshll.u32 %v107_v45, 30  ;;  %v101_v2 = vadd.s32 %v402_v4, %v399_v3 }
  0xa8   :  { %v207_v53 = vadd.s32 1, %v414_v48  ;;  %v131_v24 = vsub.s32 4, %v107_v45  ;;  %vm432_vm1 = vcmp.le.f32.partialorder %v149_v20, 0.7853982  ;;  %vm253_vm5 = vcmask 261120  }
  0xa9   :  { %v109_v52 = vsub.s32 %v105_v31, %v108_v27  ;;  %vm206_vm11 = vc.u32 %v417_v50, %v413_v47  ;;  %v205_v3 = vadd.s32 %v413_v47, %v417_v50  ;;  %vm137_vm6 = vweird.f32 %v375_v7 }
  0xaa   :  { %v208_v56 = vsel %vm206_vm11, %v207_v53, %v414_v48  ;;  %v132_v33 = vsel %vm47_vm14, %v131_v24, %v107_v45  ;;  %vm241_vm10 = vweird.f32 %v379_v13 }
  0xab   :  { %v111_v55 = vsub.s32 0, %v109_v52  ;;  %v209_v57 = vadd.s32 %v208_v56, %v204_v54  ;;  %v134_v39 = vsel %vm46_vm15, 0, %v132_v33 }
  0xac   :  { %v138_v41 = vadd.s32 3, %v134_v39 }
  0xad   :  { %v275_v58 = vmin.u32 %v111_v55, %v109_v52  ;;  %v210_v59 = vadd.s32 536870912, %v209_v57 }
  0xae   :  { %v139_v46 = vand.u32 3, %v138_v41 }
  0xaf   :  { %v113_v60 = vclz %v275_v58  ;;  %v211_v61 = vshrl.u32 %v210_v59, 30 }
  0xb0   :  { %vm144_vm2 = vcmp.eq.s32.totalorder %v139_v46, 2  ;;  %vm141_vm3 = vcmp.eq.s32.totalorder %v139_v46, 0  ;;  %vm140_vm4 = vcmp.lt.s32.totalorder %v139_v46, 2 }
  0xb1   :  { %v276_v62 = vadd.s32 4294967294, %v113_v60  ;;  %v212_v63 = vshll.u32 %v211_v61, 30  ;;  %v235_v43 = vsub.s32 4, %v211_v61 }
  0xb3   :  { %vm277_vm12 = vcmp.lt.s32.totalorder %v276_v62, 0  ;;  %v213_v1 = vsub.s32 %v209_v57, %v212_v63  ;;  %v236_v47 = vsel %vm151_vm0, %v235_v43, %v211_v61 }
  0xb4   :  { %v116_v0 = vsel %vm277_vm12, 0, %v276_v62 }
  0xb5   :  { %v117_v5 = vsub.s32 32, %v116_v0  ;;  %v121_v6 = vsub.s32 4294967266, %v116_v0  ;;  %v215_v8 = vsub.s32 0, %v213_v1  ;;  %v118_v10 = vshll.u32 %v109_v52, %v116_v0 }
  0xb6   :  { %v238_v52 = vsel %vm432_vm1, 0, %v236_v47 }
  0xb7   :  { %v119_v11 = vshrl.u32 %v101_v2, %v117_v5  ;;  %v122_v12 = vadd.s32 127, %v121_v6  ;;  %v279_v14 = vmin.u32 %v215_v8, %v213_v1  ;;  %v242_v55 = vadd.s32 3, %v238_v52 }
  0xb9   :  { %v120_v15 = vor.u32 %v119_v11, %v118_v10  ;;  %v123_v16 = vshll.u32 %v122_v12, 23  ;;  %v217_v17 = vclz %v279_v14  ;;  %v243_v57 = vand.u32 3, %v242_v55 }
  0xbb   :  { %v124_v18 = vor.u32 4788187, %v123_v16  ;;  %v280_v19 = vadd.s32 4294967294, %v217_v17  ;;  %v127_v22 = vcvt.s32.f32 %v120_v15  ;;  %vm248_vm7 = vcmp.eq.s32.totalorder %v243_v57, 2 }
  0xbc   :  { %vm245_vm8 = vcmp.eq.s32.totalorder %v243_v57, 0  ;;  %vm244_vm9 = vcmp.lt.s32.totalorder %v243_v57, 2 }
  0xbd   :  { %v125_v21 = vand.u32 2147483647, %v124_v18  ;;  %vm281_vm13 = vcmp.lt.s32.totalorder %v280_v19, 0 }
  0xbe   :  { %v220_v26 = vsel %vm281_vm13, 0, %v280_v19 }
  0xbf   :  { %v128_v23 = vmul.f32 %v127_v22, %v125_v21  ;;  %v221_v4 = vsub.s32 32, %v220_v26  ;;  %v225_v28 = vsub.s32 4294967266, %v220_v26  ;;  %v222_v25 = vshll.u32 %v213_v1, %v220_v26 }
  0xc1   :  { %v129_v29 = vxor.u32 2147483648, %v128_v23  ;;  %v223_v30 = vshrl.u32 %v205_v3, %v221_v4  ;;  %v226_v31 = vadd.s32 127, %v225_v28 }
  0xc3   :  { %v130_v32 = vsel %vm47_vm14, %v129_v29, %v128_v23  ;;  %v224_v35 = vor.u32 %v223_v30, %v222_v25  ;;  %v227_v36 = vshll.u32 %v226_v31, 23 }
  0xc4   :  { %v133_v34 = vsel %vm46_vm15, %v375_v7, %v130_v32 }
  0xc5   :  { %301 = vcosq.f32 %v133_v34  ;;  %v228_v38 = vor.u32 4788187, %v227_v36  ;;  %v231_v40 = vcvt.s32.f32 %v224_v35 }
  0xc6   :  { %303 = vsinq.f32 %v133_v34 }
  0xc7   :  { %v229_v37 = vand.u32 2147483647, %v228_v38 }
  0xc9   :  { %v232_v42 = vmul.f32 %v231_v40, %v229_v37 }
  0xcb   :  { %v233_v44 = vxor.u32 2147483648, %v232_v42 }
  0xcd   :  { %v234_v45 = vsel %vm151_vm0, %v233_v44, %v232_v42 }
  0xce   :  { %v237_v49 = vsel %vm432_vm1, %v379_v13, %v234_v45 }
  0xcf   :  { %v302_v48 = vpop.eup %301  ;;  %305 = vcosq.f32 %v237_v49 }
  0xd0   :  { %v304_v50 = vpop.eup %303  ;;  %v145_v27 = vxor.u32 2147483648, %v302_v48  ;;  %307 = vsinq.f32 %v237_v49 }
  0xd1   :  { %v142_v51 = vxor.u32 2147483648, %v304_v50 }
  0xd2   :  { %v146_v20 = vsel %vm144_vm2, %v145_v27, %v304_v50 }
  0xd3   :  { %v143_v53 = vsel %vm141_vm3, %v302_v48, %v142_v51 }
  0xd4   :  { %v147_v54 = vsel %vm140_vm4, %v143_v53, %v146_v20 }
  0xd5   :  { %v148_v56 = vsel %vm137_vm6, nan, %v147_v54 }
  0xd6   :  { %254 = vst.msk [vmem:[#allocation2] sm:$0xff] %vm253_vm5, %v148_v56 }
  0xd9   :  { %v306_v58 = vpop.eup %305 }
  0xda   :  { %v308_v59 = vpop.eup %307  ;;  %v249_v60 = vxor.u32 2147483648, %v306_v58 }
  0xdb   :  { %v246_v61 = vxor.u32 2147483648, %v308_v59 }
  0xdc   :  { %v250_v62 = vsel %vm248_vm7, %v249_v60, %v308_v59 }
  0xdd   :  { %v247_v63 = vsel %vm245_vm8, %v306_v58, %v246_v61 }
  0xde   :  { %v251_v7 = vsel %vm244_vm9, %v247_v63, %v250_v62 }
  0xdf   :  { %v252_v0 = vsel %vm241_vm10, nan, %v251_v7 }
  0xe0   :  { %255 = vst.msk [vmem:[#allocation2 + $0x8] sm:$0xff] %vm253_vm5, %v252_v0 }
  0xe1   :  { %320 = shalt.err (!%p317_p4)
}
  0xe2   :  { %s321_s22 = scalar_lea.hbm %s460_s3, 256 }
  0xe3   :  { %p322_p5 = scmp.ne.s32.totalorder %s460_s3, %s321_s22  ;;  %p325_p6 = scmp.lt.u32.totalorder %s321_s22, %s460_s3 }
  0xe5   :  { %p327_p7 = pnand %p325_p6, %p322_p5 }
  0xe7   :  { %330 = shalt.err (!%p327_p7)
}
  0xe8   :  { %s341_s27 = smov 128   ;;  %s342_s28 = smov 8  }
  0xe9   :  { %267 = dma.vmem_to_hbm [thread:$0]  %s262_s1, 256, %s460_s3, [#allocation3], %s341_s27, %s341_s27, %s342_s28  }
  0xea   :  { %331 = dma.done.wait [#allocation3], 256  }
  0xeb   :  { %332 = vsyncadd [#allocation3], 4294967040 }
  0xec   :  { %271 = vsyncpa [#allocation3], 1 }

</bundles_post_ra>
